<compile_context>
chip_gen: v6e
topology: v6e:2x2x1
jax: 0.10.0
libtpu: 0.0.40
codegen_flags: <defaults>
</compile_context>

<pallas_src>
import numpy as np
import jax
import jax.numpy as jnp
from jax.experimental import pallas as pl
from jax.experimental.pallas import tpu as pltpu

_LANES = 128


def _round_up(x, m):
    return (x + m - 1) // m * m


def _make_kernel(num_rest, param_dtype):
    """MLP kernel: Linear -> (ReLU -> Linear) * num_rest, raw-logit store."""

    def kernel(h_ref, w0_ref, wr_ref, b_ref, out_ref):
        # Layer 0: (TM, in_pad)bf16 @ (in_pad, PAD)bf16 -> f32 acc, + f32 bias.
        x = jnp.dot(h_ref[...], w0_ref[...],
                    preferred_element_type=jnp.float32) + b_ref[0]
        # Remaining layers (ReLU before each; last layer has no output ReLU).
        for i in range(num_rest):                       # static unroll
            x = jnp.maximum(x, 0.0)                     # nn.ReLU
            x = jnp.dot(x.astype(param_dtype), wr_ref[i],
                        preferred_element_type=jnp.float32) + b_ref[i + 1]
        # One lane-dense (TM, PAD) store of the raw logits.  Padded lanes are
        # exactly zero (zero-padded weights/biases) and are sliced off outside.
        out_ref[...] = x

    return kernel


def make_predict(weights, biases, z_pres_size, z_where_size, *,
                 param_dtype=jnp.bfloat16, tm=None):
    """Build a jitted Predict.forward closure with pre-packed parameters.

    weights: list of (in_i, out_i) arrays;  biases: list of (1, out_i) arrays.
    Returns forward(h) -> (z_pres_p, z_where_loc, z_where_scale).
    """
    num_layers = len(weights)
    # TODO(synk): num_layers == 1 (empty h_sizes) would need a separate path.
    assert num_layers >= 2, "expects at least one hidden layer"
    num_rest = num_layers - 1
    in_size = weights[0].shape[0]

    # Common lane-padded width for every hidden/output dimension (not the
    # input dimension — that one stays narrow to save h DMA bytes).
    widths = [w.shape[1] for w in weights] + [w.shape[0] for w in weights[1:]]
    pad = _round_up(max(widths), _LANES)
    in_pad = _round_up(in_size, 16)          # bf16 sublane granularity

    # ---- one-time host-side packing (zero padding keeps padded lanes 0) ----
    w0_np = np.zeros((in_pad, pad), np.float32)
    w0_np[:in_size, :weights[0].shape[1]] = np.asarray(weights[0], np.float32)
    wr_np = np.zeros((num_rest, pad, pad), np.float32)
    for i, w in enumerate(weights[1:]):
        wr_np[i, :w.shape[0], :w.shape[1]] = np.asarray(w, np.float32)
    b_np = np.zeros((num_layers, 1, pad), np.float32)
    for i, b in enumerate(biases):
        bv = np.asarray(b, np.float32).reshape(-1)
        b_np[i, 0, :bv.shape[0]] = bv

    w0 = jnp.asarray(w0_np, param_dtype)      # (in_pad, PAD)
    wr = jnp.asarray(wr_np, param_dtype)      # (L-1, PAD, PAD)
    bs = jnp.asarray(b_np, jnp.float32)       # (L, 1, PAD)

    kernel = _make_kernel(num_rest, param_dtype)
    p, zw = z_pres_size, z_where_size
    pbytes = jnp.dtype(param_dtype).itemsize

    @jax.jit
    def forward(h):
        B = h.shape[0]
        # Batch tiling: small B -> one grid step (per-step overhead dominates);
        # large B -> 1024-row tiles so >=2 "parallel" steps engage both v7x TCs.
        if tm is None:
            tile = _round_up(B, 16) if B <= 2048 else 1024
        else:
            tile = _round_up(tm, 16)
        b_pad = _round_up(B, tile)
        grid = (b_pad // tile,)

        # Only per-call prep: pad batch rows / cast to the matmul dtype.
        h_p = jnp.zeros((b_pad, in_pad), param_dtype)
        h_p = h_p.at[:B, :in_size].set(h.astype(param_dtype))

        flops = 2 * b_pad * (in_pad * pad + num_rest * pad * pad)
        bytes_accessed = (b_pad * in_pad * pbytes          # h
                          + in_pad * pad * pbytes          # w0
                          + num_rest * pad * pad * pbytes  # w_rest
                          + num_layers * pad * 4           # biases
                          + b_pad * pad * 4)               # logits out

        out = pl.pallas_call(
            kernel,
            out_shape=jax.ShapeDtypeStruct((b_pad, pad), jnp.float32),
            grid_spec=pltpu.PrefetchScalarGridSpec(
                num_scalar_prefetch=0,
                grid=grid,
                in_specs=[
                    # h tile: last dim equals the full array dim (< 128 is OK).
                    pl.BlockSpec((tile, in_pad), lambda i: (i, 0)),
                    # Constant-index parameter blocks -> resident in VMEM.
                    pl.BlockSpec((in_pad, pad), lambda i: (0, 0)),
                    pl.BlockSpec((num_rest, pad, pad), lambda i: (0, 0, 0)),
                    pl.BlockSpec((num_layers, 1, pad), lambda i: (0, 0, 0)),
                ],
                out_specs=pl.BlockSpec((tile, pad), lambda i: (i, 0)),
            ),
            compiler_params=pltpu.CompilerParams(
                dimension_semantics=("parallel",)),
            cost_estimate=pl.CostEstimate(
                flops=flops, transcendentals=0,
                bytes_accessed=bytes_accessed),
        )(h_p, w0, wr, bs)

        # Split + activations on the (tiny) real columns only, outside the
        # kernel — fuses into the slice in XLA.
        logits = out[:B]
        z_pres_p = jax.nn.sigmoid(logits[:, 0:p])
        z_where_loc = logits[:, p:p + zw]
        z_where_scale = jax.nn.softplus(logits[:, p + zw:p + 2 * zw])
        return z_pres_p, z_where_loc, z_where_scale

    return forward


def _init_params(key, input_size, h_sizes, output_size):
    """Deterministic synthetic parameter init (mimics nn.Linear shapes)."""
    sizes = [input_size] + h_sizes + [output_size]
    weights, biases = [], []
    for i in range(len(sizes) - 1):
        key, wk, bk = jax.random.split(key, 3)
        bound = 1.0 / float(np.sqrt(sizes[i]))
        weights.append(jax.random.uniform(
            wk, (sizes[i], sizes[i + 1]), jnp.float32, -bound, bound))
        biases.append(jax.random.uniform(
            bk, (1, sizes[i + 1]), jnp.float32, -bound, bound))
    return weights, biases


def _reference(h, weights, biases, z_pres_size, z_where_size):
    x = h
    for i, (w, b) in enumerate(zip(weights, biases)):
        x = x @ w + b
        if i < len(weights) - 1:
            x = jnp.maximum(x, 0.0)
    p, zw = z_pres_size, z_where_size
    return (jax.nn.sigmoid(x[:, 0:p]),
            x[:, p:p + zw],
            jax.nn.softplus(x[:, p + zw:p + 2 * zw]))


if __name__ == "__main__":
    # Small shapes consistent with the module's forward.
    batch = 64
    input_size = 32
    h_sizes = [32, 32]
    z_pres_size = 1
    z_where_size = 3
    output_size = z_pres_size + 2 * z_where_size  # 7

    key = jax.random.PRNGKey(0)
    key, hk = jax.random.split(key)
    h = jax.random.normal(hk, (batch, input_size), jnp.float32)
    weights, biases = _init_params(key, input_size, h_sizes, output_size)

    # Parameters packed once here (init time), not per forward call.
    predict = make_predict(weights, biases, z_pres_size, z_where_size)

    z_pres_p, z_where_loc, z_where_scale = predict(h)
    jax.block_until_ready((z_pres_p, z_where_loc, z_where_scale))

    ref = _reference(h, weights, biases, z_pres_size, z_where_size)
    assert z_pres_p.shape == (batch, z_pres_size)
    assert z_where_loc.shape == (batch, z_where_size)
    assert z_where_scale.shape == (batch, z_where_size)
    # bf16 matmul operands (f32 accumulation) vs. a pure-f32 reference.
    assert jnp.allclose(z_pres_p, ref[0], atol=5e-2, rtol=5e-2)
    assert jnp.allclose(z_where_loc, ref[1], atol=5e-2, rtol=5e-2)
    assert jnp.allclose(z_where_scale, ref[2], atol=5e-2, rtol=5e-2)

    print("KERNEL_OK")
</pallas_src>

<mosaic_0001>
module attributes {stable_mosaic.version = 11 : i64} {
  func.func @kernel(%arg0: i32, %arg1: memref<64x32xbf16, #tpu.memory_space<vmem>>, %arg2: memref<32x128xbf16, #tpu.memory_space<vmem>>, %arg3: memref<2x128x128xbf16, #tpu.memory_space<vmem>>, %arg4: memref<3x1x128xf32, #tpu.memory_space<vmem>>, %arg5: memref<64x128xf32, #tpu.memory_space<vmem>>) attributes {dimension_semantics = [#tpu.dimension_semantics<parallel>], iteration_bounds = array<i64: 1>, scalar_prefetch = 0 : i64, scratch_operands = 0 : i64, tpu.core_type = #tpu.core_type<tc>, window_params = [{transform_indices = @transform_0, window_bounds = array<i64: 64, 32>}, {pipeline_mode = #tpu.pipeline_mode<synchronous>, transform_indices = @transform_1, window_bounds = array<i64: 32, 128>}, {pipeline_mode = #tpu.pipeline_mode<synchronous>, transform_indices = @transform_2, window_bounds = array<i64: 2, 128, 128>}, {pipeline_mode = #tpu.pipeline_mode<synchronous>, transform_indices = @transform_3, window_bounds = array<i64: 3, 1, 128>}, {transform_indices = @transform_4, window_bounds = array<i64: 64, 128>}]} {
    %c0 = arith.constant 0 : index
    %c0_0 = arith.constant 0 : index
    %0 = vector.load %arg1[%c0, %c0_0] : memref<64x32xbf16, #tpu.memory_space<vmem>>, vector<64x32xbf16>
    %c0_1 = arith.constant 0 : index
    %c0_2 = arith.constant 0 : index
    %1 = vector.load %arg2[%c0_1, %c0_2] : memref<32x128xbf16, #tpu.memory_space<vmem>>, vector<32x128xbf16>
    %cst = arith.constant dense<0.000000e+00> : vector<64x128xf32>
    %2 = tpu.matmul %0, %1, %cst {dimension_numbers = #tpu.dot_dimension_numbers<[1], [0], [0], [1], [0, 0, 1, 1], [], []>} : vector<64x32xbf16>, vector<32x128xbf16>, vector<64x128xf32> -> vector<64x128xf32>
    %c0_3 = arith.constant 0 : index
    %c0_4 = arith.constant 0 : index
    %c0_5 = arith.constant 0 : index
    %3 = vector.load %arg4[%c0_3, %c0_4, %c0_5] : memref<3x1x128xf32, #tpu.memory_space<vmem>>, vector<1x1x128xf32>
    %4 = vector.shape_cast %3 : vector<1x1x128xf32> to vector<1x128xf32>
    %5 = vector.broadcast %4 : vector<1x128xf32> to vector<64x128xf32>
    %6 = arith.addf %2, %5 : vector<64x128xf32>
    %cst_6 = arith.constant 0.000000e+00 : f32
    %7 = vector.broadcast %cst_6 : f32 to vector<64x128xf32>
    %8 = arith.maximumf %6, %7 : vector<64x128xf32>
    %9 = arith.truncf %8 : vector<64x128xf32> to vector<64x128xbf16>
    %c0_7 = arith.constant 0 : index
    %c0_8 = arith.constant 0 : index
    %c0_9 = arith.constant 0 : index
    %10 = vector.load %arg3[%c0_7, %c0_8, %c0_9] : memref<2x128x128xbf16, #tpu.memory_space<vmem>>, vector<1x128x128xbf16>
    %11 = vector.shape_cast %10 : vector<1x128x128xbf16> to vector<128x128xbf16>
    %cst_10 = arith.constant dense<0.000000e+00> : vector<64x128xf32>
    %12 = tpu.matmul %9, %11, %cst_10 {dimension_numbers = #tpu.dot_dimension_numbers<[1], [0], [0], [1], [0, 0, 1, 1], [], []>} : vector<64x128xbf16>, vector<128x128xbf16>, vector<64x128xf32> -> vector<64x128xf32>
    %c1 = arith.constant 1 : index
    %c0_11 = arith.constant 0 : index
    %c0_12 = arith.constant 0 : index
    %13 = vector.load %arg4[%c1, %c0_11, %c0_12] : memref<3x1x128xf32, #tpu.memory_space<vmem>>, vector<1x1x128xf32>
    %14 = vector.shape_cast %13 : vector<1x1x128xf32> to vector<1x128xf32>
    %15 = vector.broadcast %14 : vector<1x128xf32> to vector<64x128xf32>
    %16 = arith.addf %12, %15 : vector<64x128xf32>
    %cst_13 = arith.constant 0.000000e+00 : f32
    %17 = vector.broadcast %cst_13 : f32 to vector<64x128xf32>
    %18 = arith.maximumf %16, %17 : vector<64x128xf32>
    %19 = arith.truncf %18 : vector<64x128xf32> to vector<64x128xbf16>
    %c1_14 = arith.constant 1 : index
    %c0_15 = arith.constant 0 : index
    %c0_16 = arith.constant 0 : index
    %20 = vector.load %arg3[%c1_14, %c0_15, %c0_16] : memref<2x128x128xbf16, #tpu.memory_space<vmem>>, vector<1x128x128xbf16>
    %21 = vector.shape_cast %20 : vector<1x128x128xbf16> to vector<128x128xbf16>
    %cst_17 = arith.constant dense<0.000000e+00> : vector<64x128xf32>
    %22 = tpu.matmul %19, %21, %cst_17 {dimension_numbers = #tpu.dot_dimension_numbers<[1], [0], [0], [1], [0, 0, 1, 1], [], []>} : vector<64x128xbf16>, vector<128x128xbf16>, vector<64x128xf32> -> vector<64x128xf32>
    %c2 = arith.constant 2 : index
    %c0_18 = arith.constant 0 : index
    %c0_19 = arith.constant 0 : index
    %23 = vector.load %arg4[%c2, %c0_18, %c0_19] : memref<3x1x128xf32, #tpu.memory_space<vmem>>, vector<1x1x128xf32>
    %24 = vector.shape_cast %23 : vector<1x1x128xf32> to vector<1x128xf32>
    %25 = vector.broadcast %24 : vector<1x128xf32> to vector<64x128xf32>
    %26 = arith.addf %22, %25 : vector<64x128xf32>
    %c0_20 = arith.constant 0 : index
    %c0_21 = arith.constant 0 : index
    %27 = vector.load %arg5[%c0_20, %c0_21] : memref<64x128xf32, #tpu.memory_space<vmem>>, vector<64x128xf32>
    tpu.vector_store %arg5[%c0_20, %c0_21], %26 {strides = array<i32>} : memref<64x128xf32, #tpu.memory_space<vmem>>, vector<64x128xf32>,
    return
  }
  func.func @transform_0(%arg0: i32) -> (i32, i32) {
    %c0_i32 = arith.constant 0 : i32
    %c0_i32_0 = arith.constant 0 : i32
    return %arg0, %c0_i32 : i32, i32
  }
  func.func @transform_1(%arg0: i32) -> (i32, i32) {
    %c0_i32 = arith.constant 0 : i32
    %c0_i32_0 = arith.constant 0 : i32
    %c0_i32_1 = arith.constant 0 : i32
    return %c0_i32, %c0_i32_0 : i32, i32
  }
  func.func @transform_2(%arg0: i32) -> (i32, i32, i32) {
    %c0_i32 = arith.constant 0 : i32
    %c0_i32_0 = arith.constant 0 : i32
    %c0_i32_1 = arith.constant 0 : i32
    %c0_i32_2 = arith.constant 0 : i32
    return %c0_i32, %c0_i32_0, %c0_i32_1 : i32, i32, i32
  }
  func.func @transform_3(%arg0: i32) -> (i32, i32, i32) {
    %c0_i32 = arith.constant 0 : i32
    %c0_i32_0 = arith.constant 0 : i32
    %c0_i32_1 = arith.constant 0 : i32
    %c0_i32_2 = arith.constant 0 : i32
    return %c0_i32, %c0_i32_0, %c0_i32_1 : i32, i32, i32
  }
  func.func @transform_4(%arg0: i32) -> (i32, i32) {
    %c0_i32 = arith.constant 0 : i32
    %c0_i32_0 = arith.constant 0 : i32
    return %arg0, %c0_i32 : i32, i32
  }
}

</mosaic_0001>

<bundles_post_ra>
// kernel: forward.1
= control target key start
LH: loop header
LB: loop body
LE: loop exit
PB: predicated region body
PF: predicated region fallthrough
CT: control target
= control target key end

     0   :  { %9 = vsyncpa [#allocation3], 0  ;;  %s641_s15 = smov [#allocation2]   ;;  %s727_s0 = inlined_call_operand.vmem [shape: bf16[64,32], index: 0, kind: input, shape index: {}]   ;;  %s728_s1 = inlined_call_operand.vmem [shape: bf16[32,128], index: 1, kind: input, shape index: {}]   ;;  %s729_s2 = inlined_call_operand.hbm [shape: bf16[2,128,128], index: 2, kind: input, shape index: {}]   ;;  %s730_s3 = inlined_call_operand.vmem [shape: f32[3,1,128], index: 3, kind: input, shape index: {}]   ;;  %s731_s4 = inlined_call_operand.vmem [shape: f32[64,128], index: 4, kind: output, shape index: {}]  }
   0x1   :  { %s19_s16 = sshll.u32 %s641_s15, 4  ;;  %s20_s16 = int_to_ptr.vmem [resolvable:$true] %s19_s16 }
   0x2   :  { %s627_s17 = scalar_lea.vmem %s20_s16, 2048  ;;  %p632_p1 = scmp.lt.s32.totalorder %s20_s16, %s20_s16 }
   0x3   :  { %p628_p0 = scmp.ne.s32.totalorder %s20_s16, %s627_s17  ;;  %p633_p2 = scmp.lt.s32.totalorder %s627_s17, %s627_s17 }
   0x5   :  { %p634_p3 = por %p633_p2, %p632_p1 }
   0x7   :  { %p635_p4 = pnand %p634_p3, %p628_p0 }
   0x9   :  { %638 = shalt.err (!%p635_p4)
}
   0xa   :  { %s642_s18 = smov 64   ;;  %s643_s19 = smov 4  }
   0xb   :  { %25 = dma.hbm_to_vmem [thread:$0]  %s729_s2, 2048, %s20_s16, [#allocation3], %s642_s18, %s642_s18, %s643_s19  }
   0xc   :  { %639 = dma.done.wait [#allocation3], 2048  }
   0xd   :  { %640 = vsyncadd [#allocation3], 4294965248  ;;  %v597_v0 = vld [vmem:[%s728_s1 + $0x8] sm:$0xff]   ;;  %v598_v1 = vld [vmem:[%s728_s1] sm:$0xff]   ;;  %vm83_vm0 = vcmask 261120  }
   0xe   :  { %534 = vmatprep.subr.bf16.mxu0 %v597_v0  ;;  %v599_v2 = vld [vmem:[%s727_s0] sm:$0xff]   ;;  %v600_v3 = vld [vmem:[%s727_s0 + $0x8] sm:$0xff]   ;;  %v601_v4 = vld [vmem:[%s727_s0 + $0x10] sm:$0xff]  }
   0xf   :  { %535 = vmatpush3.bf16.msra.mxu0 %v597_v0  ;;  %538 = vmatprep.mubr.msk.bf16.mxu0 %vm83_vm0, %v599_v2  ;;  %v603_v5 = vld [vmem:[#allocation2 + $0x38] sm:$0xff]   ;;  %v604_v6 = vld [vmem:[#allocation2 + $0x30] sm:$0xff]   ;;  %v605_v7 = vld [vmem:[#allocation2 + $0x28] sm:$0xff]  }
  0x10   :  { %536 = vmatprep.subr.bf16.mxu0 %v598_v1  ;;  %546 = vmatprep.subr.bf16.mxu1 %v603_v5  ;;  %v602_v8 = vld [vmem:[%s727_s0 + $0x18] sm:$0xff]   ;;  %v606_v9 = vld [vmem:[#allocation2 + $0x20] sm:$0xff]   ;;  %v608_v11 = vld [vmem:[#allocation2 + $0x10] sm:$0xff]  }
  0x11   :  { %547 = vmatpush3.bf16.msra.mxu1 %v603_v5  ;;  %v607_v10 = vld [vmem:[#allocation2 + $0x18] sm:$0xff]   ;;  %v609_v12 = vld [vmem:[#allocation2 + $0x8] sm:$0xff]   ;;  %v610_v13 = vld [vmem:[#allocation2] sm:$0xff]  }
  0x12   :  { %548 = vmatprep.subr.bf16.mxu1 %v604_v6  ;;  %v611_v14 = vld [vmem:[#allocation2 + $0x78] sm:$0xff]   ;;  %v612_v15 = vld [vmem:[#allocation2 + $0x70] sm:$0xff]   ;;  %v613_v16 = vld [vmem:[#allocation2 + $0x68] sm:$0xff]  }
  0x13   :  { %537 = vmatpush3.bf16.msra.mxu0 %v598_v1  ;;  %v614_v17 = vld [vmem:[#allocation2 + $0x60] sm:$0xff]   ;;  %v615_v18 = vld [vmem:[#allocation2 + $0x58] sm:$0xff]   ;;  %v616_v48 = vld [vmem:[#allocation2 + $0x50] sm:$0xff]  }
  0x14   :  { %570 = vmatprep.subr.bf16.mxu0 %v611_v14  ;;  %v473_v21 = vld [vmem:[%s730_s3] ss:$0 sm:$0xff]  ;;  %v617_v49 = vld [vmem:[#allocation2 + $0x48] sm:$0xff]   ;;  %v485_v53 = vld [vmem:[%s730_s3 + $0x1] ss:$0 sm:$0xff] }
  0x15   :  { %549 = vmatpush3.bf16.msra.mxu1 %v604_v6  ;;  %v618_v50 = vld [vmem:[#allocation2 + $0x40] sm:$0xff]  }
  0x16   :  { %539 = vmatmul.mubr.msk.bf16.vlgmr.msra.gmra.mxu0 %vm83_vm0, %v600_v3  ;;  %550 = vmatprep.subr.bf16.mxu1 %v605_v7 }
  0x17   :  { %542 = vmatprep.mubr.msk.bf16.mxu0 %vm83_vm0, %v601_v4  ;;  %571 = vmatpush3.bf16.msra.mxu0 %v611_v14 }
  0x18   :  { %572 = vmatprep.subr.bf16.mxu0 %v612_v15 }
  0x19   :  { %551 = vmatpush3.bf16.msra.mxu1 %v605_v7 }
  0x1a   :  { %552 = vmatprep.subr.bf16.mxu1 %v606_v9 }
  0x1b   :  { %573 = vmatpush3.bf16.msra.mxu0 %v612_v15 }
  0x1c   :  { %574 = vmatprep.subr.bf16.mxu0 %v613_v16 }
  0x1d   :  { %553 = vmatpush3.bf16.msra.mxu1 %v606_v9 }
  0x1e   :  { %543 = vmatmul.mubr.msk.bf16.gmra.mxu0 %vm83_vm0, %v602_v8  ;;  %554 = vmatprep.subr.bf16.mxu1 %v607_v10 }
  0x1f   :  { %575 = vmatpush3.bf16.msra.mxu0 %v613_v16  ;;  %v495_v16 = vld [vmem:[%s730_s3 + $0x2] ss:$0 sm:$0xff] }
  0x20   :  { %576 = vmatprep.subr.bf16.mxu0 %v614_v17 }
  0x21   :  { %555 = vmatpush3.bf16.msra.mxu1 %v607_v10 }
  0x22   :  { %556 = vmatprep.subr.bf16.mxu1 %v608_v11 }
  0x23   :  { %577 = vmatpush3.bf16.msra.mxu0 %v614_v17 }
  0x24   :  { %578 = vmatprep.subr.bf16.mxu0 %v615_v18 }
  0x25   :  { %557 = vmatpush3.bf16.msra.mxu1 %v608_v11 }
  0x26   :  { %558 = vmatprep.subr.bf16.mxu1 %v609_v12 }
  0x27   :  { %579 = vmatpush3.bf16.msra.mxu0 %v615_v18 }
  0x28   :  { %580 = vmatprep.subr.bf16.mxu0 %v616_v48 }
  0x29   :  { %559 = vmatpush3.bf16.msra.mxu1 %v609_v12 }
  0x2a   :  { %560 = vmatprep.subr.bf16.mxu1 %v610_v13 }
  0x2b   :  { %581 = vmatpush3.bf16.msra.mxu0 %v616_v48 }
  0x2c   :  { %582 = vmatprep.subr.bf16.mxu0 %v617_v49 }
  0x2d   :  { %561 = vmatpush3.bf16.msra.mxu1 %v610_v13 }
  0x2f   :  { %583 = vmatpush3.bf16.msra.mxu0 %v617_v49 }
  0x30   :  { %584 = vmatprep.subr.bf16.mxu0 %v618_v50 }
  0x33   :  { %585 = vmatpush3.bf16.msra.mxu0 %v618_v50 }
  0xd6   :  { %v540_v19 = vpop.f32.mrf.mxu0 }
  0xd7   :  { %v139_v25 = vadd.f32 %v540_v19, %v473_v21 }
  0xd8   :  { %v130_v20 = vpop.f32.mrf.mxu0 }
  0xd9   :  { %v131_v23 = vadd.f32 %v473_v21, %v130_v20  ;;  %v163_v32 = vmax.f32 %v139_v25, 0.0 }
  0xda   :  { %v541_v22 = vpop.f32.mrf.mxu0 }
  0xdb   :  { %v142_v24 = vadd.f32 %v541_v22, %v473_v21  ;;  %v161_v30 = vmax.f32 %v131_v23, 0.0 }
  0xdc   :  { %v133_v26 = vpop.f32.mrf.mxu0 }
  0xdd   :  { %v134_v27 = vadd.f32 %v473_v21, %v133_v26  ;;  %v164_v28 = vmax.f32 %v142_v24, 0.0 }
  0xde   :  { %v544_v29 = vpop.f32.mrf.mxu0 }
  0xdf   :  { %v162_v31 = vmax.f32 %v134_v27, 0.0  ;;  %v170_v35 = vpack.c.bf16 %v164_v28, %v163_v32  ;;  %v155_v39 = vadd.f32 %v544_v29, %v473_v21 }
  0xe0   :  { %v146_v33 = vpop.f32.mrf.mxu0 }
  0xe1   :  { %v169_v34 = vpack.c.bf16 %v162_v31, %v161_v30  ;;  %v147_v37 = vadd.f32 %v473_v21, %v146_v33  ;;  %v167_v45 = vmax.f32 %v155_v39, 0.0 }
  0xe2   :  { %v545_v36 = vpop.f32.mrf.mxu0 }
  0xe3   :  { %v158_v38 = vadd.f32 %v545_v36, %v473_v21  ;;  %562 = vmatprep.mubr.bf16.mxu1 %v169_v34  ;;  %v165_v43 = vmax.f32 %v147_v37, 0.0 }
  0xe4   :  { %v149_v40 = vpop.f32.mrf.mxu0  ;;  %563 = vmatmul.mubr.bf16.vlgmr.msra.gmra.mxu1 %v170_v35 }
  0xe5   :  { %v150_v41 = vadd.f32 %v473_v21, %v149_v40  ;;  %v168_v42 = vmax.f32 %v158_v38, 0.0 }
  0xe7   :  { %v166_v44 = vmax.f32 %v150_v41, 0.0  ;;  %v172_v47 = vpack.c.bf16 %v168_v42, %v167_v45 }
  0xe9   :  { %v171_v46 = vpack.c.bf16 %v166_v44, %v165_v43 }
  0xeb   :  { %566 = vmatprep.mubr.bf16.mxu1 %v171_v46 }
  0xec   :  { %567 = vmatmul.mubr.bf16.gmra.mxu1 %v172_v47 }
 0x1a4   :  { %v564_v51 = vpop.f32.mrf.mxu1 }
 0x1a5   :  { %v288_v57 = vadd.f32 %v564_v51, %v485_v53 }
 0x1a6   :  { %v279_v52 = vpop.f32.mrf.mxu1 }
 0x1a7   :  { %v280_v55 = vadd.f32 %v485_v53, %v279_v52  ;;  %v312_v0 = vmax.f32 %v288_v57, 0.0 }
 0x1a8   :  { %v565_v54 = vpop.f32.mrf.mxu1 }
 0x1a9   :  { %v291_v56 = vadd.f32 %v565_v54, %v485_v53  ;;  %v310_v62 = vmax.f32 %v280_v55, 0.0 }
 0x1aa   :  { %v282_v58 = vpop.f32.mrf.mxu1 }
 0x1ab   :  { %v283_v59 = vadd.f32 %v485_v53, %v282_v58  ;;  %v313_v60 = vmax.f32 %v291_v56, 0.0 }
 0x1ac   :  { %v568_v61 = vpop.f32.mrf.mxu1 }
 0x1ad   :  { %v311_v63 = vmax.f32 %v283_v59, 0.0  ;;  %v319_v3 = vpack.c.bf16 %v313_v60, %v312_v0  ;;  %v304_v7 = vadd.f32 %v568_v61, %v485_v53 }
 0x1ae   :  { %v295_v1 = vpop.f32.mrf.mxu1 }
 0x1af   :  { %v318_v2 = vpack.c.bf16 %v311_v63, %v310_v62  ;;  %v296_v5 = vadd.f32 %v485_v53, %v295_v1  ;;  %v316_v13 = vmax.f32 %v304_v7, 0.0 }
 0x1b0   :  { %v569_v4 = vpop.f32.mrf.mxu1 }
 0x1b1   :  { %v307_v6 = vadd.f32 %v569_v4, %v485_v53  ;;  %586 = vmatprep.mubr.bf16.mxu0 %v318_v2  ;;  %v314_v11 = vmax.f32 %v296_v5, 0.0 }
 0x1b2   :  { %v298_v8 = vpop.f32.mrf.mxu1  ;;  %587 = vmatmul.mubr.bf16.vlgmr.msra.gmra.mxu0 %v319_v3 }
 0x1b3   :  { %v299_v9 = vadd.f32 %v485_v53, %v298_v8  ;;  %v317_v10 = vmax.f32 %v307_v6, 0.0 }
 0x1b5   :  { %v315_v12 = vmax.f32 %v299_v9, 0.0  ;;  %v321_v15 = vpack.c.bf16 %v317_v10, %v316_v13 }
 0x1b7   :  { %v320_v14 = vpack.c.bf16 %v315_v12, %v314_v11 }
 0x1b9   :  { %590 = vmatprep.mubr.bf16.mxu0 %v320_v14 }
 0x1ba   :  { %591 = vmatmul.mubr.bf16.gmra.mxu0 %v321_v15 }
 0x272   :  { %v588_v17 = vpop.f32.mrf.mxu0 }
 0x273   :  { %v438_v18 = vadd.f32 %v588_v17, %v495_v16 }
 0x274   :  { %v429_v19 = vpop.f32.mrf.mxu0 }
 0x275   :  { %462 = vst [vmem:[%s731_s4 + $0x10] sm:$0xff] %v438_v18  ;;  %v430_v20 = vadd.f32 %v495_v16, %v429_v19 }
 0x276   :  { %v589_v21 = vpop.f32.mrf.mxu0 }
 0x277   :  { %460 = vst [vmem:[%s731_s4] sm:$0xff] %v430_v20  ;;  %v441_v22 = vadd.f32 %v589_v21, %v495_v16 }
 0x278   :  { %v432_v23 = vpop.f32.mrf.mxu0 }
 0x279   :  { %463 = vst [vmem:[%s731_s4 + $0x18] sm:$0xff] %v441_v22  ;;  %v433_v24 = vadd.f32 %v495_v16, %v432_v23 }
 0x27a   :  { %v592_v25 = vpop.f32.mrf.mxu0 }
 0x27b   :  { %461 = vst [vmem:[%s731_s4 + $0x8] sm:$0xff] %v433_v24  ;;  %v454_v26 = vadd.f32 %v592_v25, %v495_v16 }
 0x27c   :  { %v445_v27 = vpop.f32.mrf.mxu0 }
 0x27d   :  { %466 = vst [vmem:[%s731_s4 + $0x30] sm:$0xff] %v454_v26  ;;  %v446_v28 = vadd.f32 %v495_v16, %v445_v27 }
 0x27e   :  { %v593_v29 = vpop.f32.mrf.mxu0 }
 0x27f   :  { %464 = vst [vmem:[%s731_s4 + $0x20] sm:$0xff] %v446_v28  ;;  %v457_v30 = vadd.f32 %v593_v29, %v495_v16 }
 0x280   :  { %v448_v31 = vpop.f32.mrf.mxu0 }
 0x281   :  { %467 = vst [vmem:[%s731_s4 + $0x38] sm:$0xff] %v457_v30  ;;  %v449_v32 = vadd.f32 %v495_v16, %v448_v31 }
 0x283   :  { %465 = vst [vmem:[%s731_s4 + $0x28] sm:$0xff] %v449_v32 }
 0x284   :  { %472 = vsyncpa [#allocation3], 1 }

</bundles_post_ra>
